<compile_context>
chip_gen: v5e
topology: v5e:2x2
jax: 0.10.0
libtpu: 0.0.40
codegen_flags: <defaults>
</compile_context>

<pallas_src>
import jax
import jax.numpy as jnp
from jax.experimental import pallas as pl
from jax.experimental.pallas import tpu as pltpu


BN_EPS = 1e-5


def predictor_kernel(x_ref, w1_ref, gamma_ref, beta_ref, w2_ref, b2_ref, o_ref):
    # fc1: (B, Din) @ (Din, H). bf16 operands, f32 accumulate on the MXU.
    # fc1 bias omitted: cancelled exactly by training-mode BatchNorm (mean subtraction).
    x_bf = x_ref[...].astype(jnp.bfloat16)
    h = jnp.dot(x_bf, w1_ref[...], preferred_element_type=jnp.float32)  # (B, H) f32

    # BatchNorm1d (training mode, biased variance), folded into one scale/shift.
    # All elementwise BN/ReLU math stays f32 (v5e VPU/EUP have no bf16 path).
    mean = jnp.mean(h, axis=0, keepdims=True)                 # (1, H)
    ex2 = jnp.mean(h * h, axis=0, keepdims=True)              # (1, H)
    var = ex2 - mean * mean                                   # biased batch variance
    scale = gamma_ref[...] * jax.lax.rsqrt(var + BN_EPS)      # (1, H)
    shift = beta_ref[...] - mean * scale                      # (1, H)

    # normalize + affine (2 full (B,H) passes) then ReLU
    h_act = jnp.maximum(h * scale + shift, 0.0)

    # fc2: (B, H) @ (H, Dout) + (1, Dout). bf16 operands, f32 accumulate.
    o_ref[...] = (
        jnp.dot(h_act.astype(jnp.bfloat16), w2_ref[...], preferred_element_type=jnp.float32)
        + b2_ref[...]
    ).astype(o_ref.dtype)


def predictor_forward(x, w1, b1, gamma, beta, w2, b2):
    """x: (B, Din) f32. w1: (Din, H), w2: (H, Dout) — stored bf16 (cast if not).
    b1 is accepted for API parity with the PyTorch module but is mathematically
    redundant under training-mode BN and therefore not sent to the kernel."""
    del b1  # cancelled by BatchNorm mean subtraction; forward output is identical
    B, Din = x.shape
    H, Dout = w2.shape

    w1 = w1.astype(jnp.bfloat16)
    w2 = w2.astype(jnp.bfloat16)

    vmem_spec = pl.BlockSpec(memory_space=pltpu.MemorySpace.VMEM)

    flops = 2 * B * Din * H + 2 * B * H * Dout
    bytes_accessed = (
        x.size * 4          # x f32
        + w1.size * 2       # w1 bf16
        + w2.size * 2       # w2 bf16
        + (gamma.size + beta.size + b2.size) * 4
        + B * Dout * 4      # output f32
    )

    return pl.pallas_call(
        predictor_kernel,
        out_shape=jax.ShapeDtypeStruct((B, Dout), jnp.float32),
        grid=(),
        in_specs=[vmem_spec] * 6,
        out_specs=vmem_spec,
        cost_estimate=pl.CostEstimate(
            flops=flops, transcendentals=H, bytes_accessed=bytes_accessed
        ),
    )(x, w1, gamma, beta, w2, b2)


def reference_forward_bf16(x, w1, b1, gamma, beta, w2, b2):
    """Mirrors the kernel's matmul precision (bf16 operands, f32 accumulate) but keeps
    the fc1 bias and the unfused BN formulation — validates the algebraic rewrites."""
    h = jnp.dot(x.astype(jnp.bfloat16), w1.astype(jnp.bfloat16),
                preferred_element_type=jnp.float32) + b1
    mean = jnp.mean(h, axis=0, keepdims=True)
    var = jnp.mean((h - mean) ** 2, axis=0, keepdims=True)
    h = (h - mean) / jnp.sqrt(var + BN_EPS) * gamma + beta
    h = jnp.maximum(h, 0.0)
    return jnp.dot(h.astype(jnp.bfloat16), w2.astype(jnp.bfloat16),
                   preferred_element_type=jnp.float32) + b2


def reference_forward_f32(x, w1, b1, gamma, beta, w2, b2):
    """Full-precision reference of the original PyTorch forward."""
    h = x @ w1 + b1
    mean = jnp.mean(h, axis=0, keepdims=True)
    var = jnp.mean((h - mean) ** 2, axis=0, keepdims=True)
    h = (h - mean) / jnp.sqrt(var + BN_EPS) * gamma + beta
    h = jnp.maximum(h, 0.0)
    return h @ w2 + b2


if __name__ == "__main__":
    # Small shapes consistent with the module (input_dim -> hidden_dim -> output_dim)
    B, Din, H, Dout = 8, 256, 128, 256

    key = jax.random.PRNGKey(0)
    kx, kw1, kb1, kw2, kb2 = jax.random.split(key, 5)

    x = jax.random.normal(kx, (B, Din), dtype=jnp.float32)

    # Deterministic PyTorch-Linear-style init: U(-1/sqrt(fan_in), 1/sqrt(fan_in))
    lim1 = 1.0 / (Din ** 0.5)
    w1 = jax.random.uniform(kw1, (Din, H), minval=-lim1, maxval=lim1, dtype=jnp.float32)
    b1 = jax.random.uniform(kb1, (1, H), minval=-lim1, maxval=lim1, dtype=jnp.float32)

    lim2 = 1.0 / (H ** 0.5)
    w2 = jax.random.uniform(kw2, (H, Dout), minval=-lim2, maxval=lim2, dtype=jnp.float32)
    b2 = jax.random.uniform(kb2, (1, Dout), minval=-lim2, maxval=lim2, dtype=jnp.float32)

    # BatchNorm1d default affine init: gamma = 1, beta = 0
    gamma = jnp.ones((1, H), dtype=jnp.float32)
    beta = jnp.zeros((1, H), dtype=jnp.float32)

    # Weights stored bf16 in HBM (halves weight DMA; native MXU bf16 path).
    w1_bf16 = w1.astype(jnp.bfloat16)
    w2_bf16 = w2.astype(jnp.bfloat16)

    out = predictor_forward(x, w1_bf16, b1, gamma, beta, w2_bf16, b2)
    out = jax.block_until_ready(out)
    assert out.shape == (B, Dout)

    # 1) Tight check against a reference with identical matmul precision but WITH the
    #    fc1 bias and unfused BN -> validates the b1-drop and BN-fold rewrites.
    ref_bf16 = reference_forward_bf16(x, w1, b1, gamma, beta, w2, b2)
    assert jnp.allclose(out, ref_bf16, atol=1e-2, rtol=1e-2)

    # 2) Loose sanity check against the full f32 PyTorch-equivalent forward.
    ref_f32 = reference_forward_f32(x, w1, b1, gamma, beta, w2, b2)
    assert jnp.allclose(out, ref_f32, atol=5e-2, rtol=5e-2)

    print("KERNEL_OK")
</pallas_src>

<mosaic_0001>
module attributes {stable_mosaic.version = 11 : i64} {
  func.func @predictor_kernel(%arg0: memref<8x256xf32, #tpu.memory_space<vmem>>, %arg1: memref<256x128xbf16, #tpu.memory_space<vmem>>, %arg2: memref<1x128xf32, #tpu.memory_space<vmem>>, %arg3: memref<1x128xf32, #tpu.memory_space<vmem>>, %arg4: memref<128x256xbf16, #tpu.memory_space<vmem>>, %arg5: memref<1x256xf32, #tpu.memory_space<vmem>>, %arg6: memref<8x256xf32, #tpu.memory_space<vmem>>) attributes {dimension_semantics = [], scalar_prefetch = 0 : i64, scratch_operands = 0 : i64, tpu.core_type = #tpu.core_type<tc>} {
    %c0 = arith.constant 0 : index
    %c0_0 = arith.constant 0 : index
    %0 = vector.load %arg0[%c0, %c0_0] : memref<8x256xf32, #tpu.memory_space<vmem>>, vector<8x256xf32>
    %1 = arith.truncf %0 : vector<8x256xf32> to vector<8x256xbf16>
    %c0_1 = arith.constant 0 : index
    %c0_2 = arith.constant 0 : index
    %2 = vector.load %arg1[%c0_1, %c0_2] : memref<256x128xbf16, #tpu.memory_space<vmem>>, vector<256x128xbf16>
    %cst = arith.constant dense<0.000000e+00> : vector<8x128xf32>
    %3 = tpu.matmul %1, %2, %cst {dimension_numbers = #tpu.dot_dimension_numbers<[1], [0], [0], [1], [0, 0, 1, 1], [], []>} : vector<8x256xbf16>, vector<256x128xbf16>, vector<8x128xf32> -> vector<8x128xf32>
    %cst_3 = arith.constant dense<0.000000e+00> : vector<128xf32>
    %4 = vector.multi_reduction <add>, %3, %cst_3 [0] : vector<8x128xf32> to vector<128xf32>
    %5 = vector.shape_cast %4 : vector<128xf32> to vector<1x128xf32>
    %cst_4 = arith.constant 8.000000e+00 : f32
    %6 = vector.broadcast %cst_4 : f32 to vector<1x128xf32>
    %7 = arith.divf %5, %6 : vector<1x128xf32>
    %8 = arith.mulf %3, %3 : vector<8x128xf32>
    %cst_5 = arith.constant dense<0.000000e+00> : vector<128xf32>
    %9 = vector.multi_reduction <add>, %8, %cst_5 [0] : vector<8x128xf32> to vector<128xf32>
    %10 = vector.shape_cast %9 : vector<128xf32> to vector<1x128xf32>
    %cst_6 = arith.constant 8.000000e+00 : f32
    %11 = vector.broadcast %cst_6 : f32 to vector<1x128xf32>
    %12 = arith.divf %10, %11 : vector<1x128xf32>
    %13 = arith.mulf %7, %7 : vector<1x128xf32>
    %14 = arith.subf %12, %13 : vector<1x128xf32>
    %c0_7 = arith.constant 0 : index
    %c0_8 = arith.constant 0 : index
    %15 = vector.load %arg2[%c0_7, %c0_8] : memref<1x128xf32, #tpu.memory_space<vmem>>, vector<1x128xf32>
    %cst_9 = arith.constant 9.99999974E-6 : f32
    %16 = vector.broadcast %cst_9 : f32 to vector<1x128xf32>
    %17 = arith.addf %14, %16 : vector<1x128xf32>
    %18 = math.rsqrt %17 : vector<1x128xf32>
    %19 = arith.mulf %15, %18 : vector<1x128xf32>
    %c0_10 = arith.constant 0 : index
    %c0_11 = arith.constant 0 : index
    %20 = vector.load %arg3[%c0_10, %c0_11] : memref<1x128xf32, #tpu.memory_space<vmem>>, vector<1x128xf32>
    %21 = arith.mulf %7, %19 : vector<1x128xf32>
    %22 = arith.subf %20, %21 : vector<1x128xf32>
    %23 = vector.broadcast %19 : vector<1x128xf32> to vector<8x128xf32>
    %24 = arith.mulf %3, %23 : vector<8x128xf32>
    %25 = vector.broadcast %22 : vector<1x128xf32> to vector<8x128xf32>
    %26 = arith.addf %24, %25 : vector<8x128xf32>
    %cst_12 = arith.constant 0.000000e+00 : f32
    %27 = vector.broadcast %cst_12 : f32 to vector<8x128xf32>
    %28 = arith.maximumf %26, %27 : vector<8x128xf32>
    %29 = arith.truncf %28 : vector<8x128xf32> to vector<8x128xbf16>
    %c0_13 = arith.constant 0 : index
    %c0_14 = arith.constant 0 : index
    %30 = vector.load %arg4[%c0_13, %c0_14] : memref<128x256xbf16, #tpu.memory_space<vmem>>, vector<128x256xbf16>
    %cst_15 = arith.constant dense<0.000000e+00> : vector<8x256xf32>
    %31 = tpu.matmul %29, %30, %cst_15 {dimension_numbers = #tpu.dot_dimension_numbers<[1], [0], [0], [1], [0, 0, 1, 1], [], []>} : vector<8x128xbf16>, vector<128x256xbf16>, vector<8x256xf32> -> vector<8x256xf32>
    %c0_16 = arith.constant 0 : index
    %c0_17 = arith.constant 0 : index
    %32 = vector.load %arg5[%c0_16, %c0_17] : memref<1x256xf32, #tpu.memory_space<vmem>>, vector<1x256xf32>
    %33 = vector.broadcast %32 : vector<1x256xf32> to vector<8x256xf32>
    %34 = arith.addf %31, %33 : vector<8x256xf32>
    %c0_18 = arith.constant 0 : index
    %c0_19 = arith.constant 0 : index
    %35 = vector.load %arg6[%c0_18, %c0_19] : memref<8x256xf32, #tpu.memory_space<vmem>>, vector<8x256xf32>
    tpu.vector_store %arg6[%c0_18, %c0_19], %34 {strides = array<i32>} : memref<8x256xf32, #tpu.memory_space<vmem>>, vector<8x256xf32>,
    return
  }
}

</mosaic_0001>

<bundles_post_ra>
// kernel: tpu_custom_call.1
= control target key start
LH: loop header
LB: loop body
LE: loop exit
PB: predicated region body
PF: predicated region fallthrough
CT: control target
= control target key end

     0   :  { %11 = vsyncpa [#allocation3], 0  ;;  %s808_s0 = inlined_call_operand.hbm [shape: f32[8,256], index: 0, kind: input, shape index: {}]   ;;  %s809_s1 = inlined_call_operand.hbm [shape: bf16[256,128], index: 1, kind: input, shape index: {}]   ;;  %s810_s2 = inlined_call_operand.vmem [shape: f32[1,128], index: 2, kind: input, shape index: {}]   ;;  %s811_s3 = inlined_call_operand.hbm [shape: f32[1,128], index: 3, kind: input, shape index: {}]   ;;  %s812_s4 = inlined_call_operand.hbm [shape: bf16[128,256], index: 4, kind: input, shape index: {}]   ;;  %s813_s5 = inlined_call_operand.vmem [shape: f32[1,256], index: 5, kind: input, shape index: {}]   ;;  %s814_s6 = inlined_call_operand.hbm [shape: f32[8,256], index: 6, kind: output, shape index: {}]  }
   0x1   :  { %12 = vsyncpa [#allocation6], 0 }
   0x2   :  { %13 = vsyncpa [#allocation9], 0  ;;  %s30_s23 = sshll.u32 %s809_s1, 4  ;;  %s31_s23 = int_to_ptr.hbm [resolvable:$true] %s30_s23 }
   0x3   :  { %14 = vsyncpa [#allocation4], 0  ;;  %s742_s24 = smov [#allocation5]   ;;  %s20_s28 = sshll.u32 %s808_s0, 4  ;;  %s21_s28 = int_to_ptr.hbm [resolvable:$true] %s20_s28 }
   0x4   :  { %s32_s25 = sshll.u32 %s742_s24, 4  ;;  %s743_s29 = smov 64   ;;  %s33_s25 = int_to_ptr.vmem [resolvable:$true] %s32_s25 }
   0x5   :  { %s744_s30 = smov 4   ;;  %s745_s7 = smov [#allocation2]  }
   0x6   :  { %38 = dma.hbm_to_vmem [thread:$0]  %s31_s23, 2048, %s33_s25, [#allocation6], %s743_s29, %s743_s29, %s744_s30  }
   0x7   :  { %s22_s8 = sshll.u32 %s745_s7, 4  ;;  %s46_s11 = sshll.u32 %s811_s3, 4  ;;  %s23_s8 = int_to_ptr.vmem [resolvable:$true] %s22_s8  ;;  %s47_s11 = int_to_ptr.hbm [resolvable:$true] %s46_s11 }
   0x8   :  { %25 = dma.hbm_to_vmem [thread:$0]  %s21_s28, 256, %s23_s8, [#allocation3]  }
   0x9   :  { %s56_s13 = sshll.u32 %s812_s4, 4  ;;  %s746_s14 = smov [#allocation7]   ;;  %s57_s13 = int_to_ptr.hbm [resolvable:$true] %s56_s13 }
   0xa   :  { %s48_s15 = sshll.u32 %s746_s14, 4  ;;  %s747_s0 = smov [#allocation8]   ;;  %s49_s15 = int_to_ptr.vmem [resolvable:$true] %s48_s15 }
   0xb   :  { %51 = dma.hbm_to_vmem [thread:$0]  %s47_s11, 16, %s49_s15, [#allocation6]  }
   0xc   :  { %s58_s16 = sshll.u32 %s747_s0, 4  ;;  %s748_s17 = smov 128   ;;  %s59_s16 = int_to_ptr.vmem [resolvable:$true] %s58_s16 }
   0xd   :  { %s749_s18 = smov 8  }
   0xe   :  { %64 = dma.hbm_to_vmem [thread:$0]  %s57_s13, 2048, %s59_s16, [#allocation9], %s748_s17, %s748_s17, %s749_s18  }
   0xf   :  { %734 = dma.done.wait [#allocation3], 256  }
  0x10   :  { %735 = vsyncadd [#allocation3], 4294967040 }
  0x11   :  { %736 = dma.done.wait [#allocation6], 2064  }
  0x12   :  { %737 = vsyncadd [#allocation6], 4294965232 }
  0x13   :  { %738 = dma.done.wait [#allocation9], 2048  }
  0x14   :  { %739 = vsyncadd [#allocation9], 4294965248  ;;  %v575_v0 = vld [vmem:[#allocation5 + $0x38] sm:$0xff]  ;;  %v574_v2 = vld [vmem:[#allocation5 + $0x30] sm:$0xff]  ;;  %v750_v36 = vmov 8.0   ;;  %s428_s24 = sshll.u32 %s814_s6, 4  ;;  %s429_s24 = int_to_ptr.hbm [resolvable:$true] %s428_s24 }
  0x15   :  { %v583_v1 = vld [vmem:[#allocation5 + $0x78] sm:$0xff]  ;;  %215 = vmatpush.bf16.msra.mxu0 %v575_v0  ;;  %v582_v3 = vld [vmem:[#allocation5 + $0x70] sm:$0xff]  ;;  %v573_v4 = vld [vmem:[#allocation5 + $0x28] sm:$0xff]  ;;  %610 = vrcp.f32 %v750_v36 }
  0x16   :  { %228 = vmatpush.bf16.msra.mxu1 %v583_v1  ;;  %v581_v5 = vld [vmem:[#allocation5 + $0x68] sm:$0xff]  ;;  %v572_v6 = vld [vmem:[#allocation5 + $0x20] sm:$0xff]  ;;  %v571_v8 = vld [vmem:[#allocation5 + $0x18] sm:$0xff] }
  0x17   :  { %v580_v7 = vld [vmem:[#allocation5 + $0x60] sm:$0xff]  ;;  %v579_v9 = vld [vmem:[#allocation5 + $0x58] sm:$0xff]  ;;  %v570_v10 = vld [vmem:[#allocation5 + $0x10] sm:$0xff] }
  0x18   :  { %v578_v11 = vld [vmem:[#allocation5 + $0x50] sm:$0xff]  ;;  %v569_v12 = vld [vmem:[#allocation5 + $0x8] sm:$0xff]  ;;  %v568_v14 = vld [vmem:[#allocation5] sm:$0xff] }
  0x19   :  { %216 = vmatpush.bf16.msra.mxu0 %v574_v2  ;;  %v577_v13 = vld [vmem:[#allocation5 + $0x48] sm:$0xff]  ;;  %v576_v15 = vld [vmem:[#allocation5 + $0x40] sm:$0xff]  ;;  %v83_v16 = vld [vmem:[#allocation2] sm:$0xff] }
  0x1a   :  { %229 = vmatpush.bf16.msra.mxu1 %v582_v3  ;;  %v84_v17 = vld [vmem:[#allocation2 + $0x8] sm:$0xff]  ;;  %v85_v18 = vpack.c.bf16 %v83_v16, %v83_v16  ;;  %v562_v20 = vld [vmem:[#allocation8 + $0x70] sm:$0xf]  ;;  %v554_v25 = vld [vmem:[#allocation8 + $0x60] sm:$0xf] }
  0x1b   :  { %v86_v19 = vpack.c.bf16 %v84_v17, %v84_v17  ;;  %v599_v21 = vld [vmem:[#allocation8 + $0x74] sm:$0xf0]  ;;  %v598_v22 = vld [vmem:[#allocation8 + $0x74] sm:$0xf]  ;;  %v564_v24 = vld [vmem:[#allocation8 + $0x78] sm:$0xf0]  ;;  %v611_v44 = vpop.eup %610 }
  0x1c   :  { %v563_v23 = vor.u32 %v599_v21, %v562_v20  ;;  %v597_v26 = vld [vmem:[#allocation8 + $0x64] sm:$0xf0]  ;;  %v567_v27 = vor.u32 %v598_v22, %v564_v24  ;;  %v596_v28 = vld [vmem:[#allocation8 + $0x64] sm:$0xf]  ;;  %v556_v29 = vld [vmem:[#allocation8 + $0x68] sm:$0xf0]  ;;  %vm252_vm0 = vweird.f32 %v611_v44 }
  0x1d   :  { %217 = vmatpush.bf16.msra.mxu0 %v573_v4  ;;  %v555_v30 = vor.u32 %v597_v26, %v554_v25  ;;  %v559_v31 = vor.u32 %v596_v28, %v556_v29  ;;  %v546_v32 = vld [vmem:[#allocation8 + $0x50] sm:$0xf]  ;;  %v595_v33 = vld [vmem:[#allocation8 + $0x54] sm:$0xf0]  ;;  %v594_v34 = vld [vmem:[#allocation8 + $0x54] sm:$0xf] }
  0x1e   :  { %230 = vmatpush.bf16.msra.mxu1 %v581_v5  ;;  %393 = vmatpush.bf16.msra.mxu2 %v563_v23  ;;  %v548_v35 = vld [vmem:[#allocation8 + $0x58] sm:$0xf0]  ;;  %v547_v37 = vor.u32 %v595_v33, %v546_v32  ;;  %v538_v39 = vld [vmem:[#allocation8 + $0x40] sm:$0xf]  ;;  %v593_v40 = vld [vmem:[#allocation8 + $0x44] sm:$0xf0] }
  0x1f   :  { %406 = vmatpush.bf16.msra.mxu3 %v567_v27  ;;  %v551_v38 = vor.u32 %v594_v34, %v548_v35  ;;  %v592_v41 = vld [vmem:[#allocation8 + $0x44] sm:$0xf]  ;;  %v540_v42 = vld [vmem:[#allocation8 + $0x48] sm:$0xf0]  ;;  %v539_v43 = vor.u32 %v593_v40, %v538_v39  ;;  %v530_v46 = vld [vmem:[#allocation8 + $0x30] sm:$0xf] }
  0x20   :  { %v543_v45 = vor.u32 %v592_v41, %v540_v42  ;;  %v591_v47 = vld [vmem:[#allocation8 + $0x34] sm:$0xf0]  ;;  %v590_v48 = vld [vmem:[#allocation8 + $0x34] sm:$0xf]  ;;  %v532_v49 = vld [vmem:[#allocation8 + $0x38] sm:$0xf0] }
  0x21   :  { %218 = vmatpush.bf16.msra.mxu0 %v572_v6  ;;  %v531_v50 = vor.u32 %v591_v47, %v530_v46  ;;  %v248_v51 = vmul.f32 8.0, %v611_v44  ;;  %v535_v52 = vor.u32 %v590_v48, %v532_v49  ;;  %v522_v53 = vld [vmem:[#allocation8 + $0x20] sm:$0xf]  ;;  %v589_v54 = vld [vmem:[#allocation8 + $0x24] sm:$0xf0] }
  0x22   :  { %231 = vmatpush.bf16.msra.mxu1 %v580_v7  ;;  %394 = vmatpush.bf16.msra.mxu2 %v555_v30  ;;  %v588_v55 = vld [vmem:[#allocation8 + $0x24] sm:$0xf]  ;;  %v524_v56 = vld [vmem:[#allocation8 + $0x28] sm:$0xf0]  ;;  %v523_v59 = vor.u32 %v589_v54, %v522_v53  ;;  %v514_v63 = vld [vmem:[#allocation8 + $0x10] sm:$0xf] }
  0x23   :  { %407 = vmatpush.bf16.msra.mxu3 %v559_v31  ;;  %v249_v60 = vsub.f32 1.0, %v248_v51  ;;  %v527_v62 = vor.u32 %v588_v55, %v524_v56  ;;  %v587_v0 = vld [vmem:[#allocation8 + $0x14] sm:$0xf0]  ;;  %v586_v1 = vld [vmem:[#allocation8 + $0x14] sm:$0xf] }
  0x24   :  { %v516_v2 = vld [vmem:[#allocation8 + $0x18] sm:$0xf0]  ;;  %v515_v5 = vor.u32 %v587_v0, %v514_v63  ;;  %v265_v39 = vld [vmem:[%s810_s2] sm:$0x1]  ;;  %s751_s2 = smov [#allocation10]  }
  0x25   :  { %219 = vmatpush.bf16.msra.mxu0 %v571_v8  ;;  %v250_v6 = vmul.f32 %v611_v44, %v249_v60  ;;  %s426_s21 = sshll.u32 %s751_s2, 4  ;;  %s427_s21 = int_to_ptr.vmem [resolvable:$true] %s426_s21 }
  0x26   :  { %232 = vmatpush.bf16.msra.mxu1 %v579_v9  ;;  %395 = vmatpush.bf16.msra.mxu2 %v547_v37  ;;  %v519_v9 = vor.u32 %v586_v1, %v516_v2 }
  0x27   :  { %408 = vmatpush.bf16.msra.mxu3 %v551_v38 }
  0x29   :  { %220 = vmatpush.bf16.msra.mxu0 %v570_v10  ;;  %v506_v10 = vld [vmem:[#allocation8] sm:$0xf] }
  0x2a   :  { %233 = vmatpush.bf16.msra.mxu1 %v578_v11  ;;  %396 = vmatpush.bf16.msra.mxu2 %v539_v43  ;;  %v585_v11 = vld [vmem:[#allocation8 + $0x4] sm:$0xf0]  ;;  %v278_v43 = vld [vmem:[#allocation7] sm:$0x1] }
  0x2b   :  { %409 = vmatpush.bf16.msra.mxu3 %v543_v45 }
  0x2d   :  { %221 = vmatpush.bf16.msra.mxu0 %v569_v12  ;;  %v584_v12 = vld [vmem:[#allocation8 + $0x4] sm:$0xf] }
  0x2e   :  { %234 = vmatpush.bf16.msra.mxu1 %v577_v13  ;;  %397 = vmatpush.bf16.msra.mxu2 %v531_v50  ;;  %v508_v13 = vld [vmem:[#allocation8 + $0x8] sm:$0xf0] }
  0x2f   :  { %410 = vmatpush.bf16.msra.mxu3 %v535_v52  ;;  %v511_v22 = vor.u32 %v584_v12, %v508_v13  ;;  %v307_v52 = vld [vmem:[%s813_s5] sm:$0x3] }
  0x30   :  { %v309_v53 = vperm.slane %v307_v52, 0  ;;  %v310_v54 = vperm.slane %v307_v52, 1 }
  0x31   :  { %222 = vmatpush.bf16.msra.mxu0 %v568_v14 }
  0x32   :  { %235 = vmatpush.bf16.msra.mxu1 %v576_v15  ;;  %398 = vmatpush.bf16.msra.mxu2 %v523_v59 }
  0x33   :  { %411 = vmatpush.bf16.msra.mxu3 %v527_v62 }
  0x34   :  { %223 = vmatmul.bf16.vlgmr.msra.gmra.mxu0 %v85_v18  ;;  %v507_v18 = vor.u32 %v585_v11, %v506_v10 }
  0x35   :  { %236 = vmatmul.bf16.vlgmr.msra.gmra.mxu1 %v86_v19  ;;  %v251_v19 = vadd.f32 %v611_v44, %v250_v6 }
  0x36   :  { %399 = vmatpush.bf16.msra.mxu2 %v515_v5 }
  0x37   :  { %412 = vmatpush.bf16.msra.mxu3 %v519_v9  ;;  %v253_v25 = vsel %vm252_vm0, %v611_v44, %v251_v19 }
  0x3a   :  { %400 = vmatpush.bf16.msra.mxu2 %v507_v18 }
  0x3b   :  { %413 = vmatpush.bf16.msra.mxu3 %v511_v22 }
  0xb1   :  { %v224_v57 = vpop.f32.mrf.mxu0 }
  0xb2   :  { %v237_v58 = vpop.f32.mrf.mxu1 }
  0xb3   :  { %v238_v61 = vadd.f32 %v237_v58, %v224_v57 }
  0xb5   :  { %v241_v3 = vrot.slane %v238_v61, 4  ;;  %v255_v4 = vmul.f32 %v238_v61, %v238_v61 }
  0xb7   :  { %v242_v7 = vadd.f32 %v241_v3, %v238_v61  ;;  %v256_v8 = vrot.slane %v255_v4, 4 }
  0xb9   :  { %v243_v14 = vrot.slane %v242_v7, 2  ;;  %v257_v15 = vadd.f32 %v256_v8, %v255_v4  ;;  %v226_v16 = vpop.f32.mrf.mxu0 }
  0xba   :  { %v239_v17 = vpop.f32.mrf.mxu1 }
  0xbb   :  { %v244_v20 = vadd.f32 %v243_v14, %v242_v7  ;;  %v258_v21 = vrot.slane %v257_v15, 2 }
  0xbd   :  { %v245_v23 = vrot.slane %v244_v20, 1  ;;  %v259_v24 = vadd.f32 %v258_v21, %v257_v15 }
  0xbf   :  { %v260_v26 = vrot.slane %v259_v24, 1  ;;  %v246_v27 = vadd.f32 %v245_v23, %v244_v20 }
  0xc1   :  { %v254_v28 = vmul.f32 %v253_v25, %v246_v27  ;;  %v261_v29 = vadd.f32 %v260_v26, %v259_v24 }
  0xc3   :  { %v262_v30 = vmul.f32 %v261_v29, %v253_v25  ;;  %v263_v31 = vmul.f32 %v254_v28, %v254_v28 }
  0xc5   :  { %v264_v32 = vsub.f32 %v262_v30, %v263_v31 }
  0xc7   :  { %v266_v33 = vadd.f32 1e-05, %v264_v32 }
  0xc9   :  { %612 = vrsqrt.f32 %v266_v33  ;;  %vm273_vm2 = vweird.f32 %v266_v33 }
  0xcf   :  { %v613_v34 = vpop.eup %612 }
  0xd0   :  { %v268_v35 = vmul.f32 %v613_v34, %v266_v33  ;;  %vm274_vm1 = vweird.f32 %v613_v34 }
  0xd1   :  { %vm275_vm3 = vmor %vm273_vm2, %vm274_vm1 }
  0xd2   :  { %v269_v36 = vmul.f32 %v613_v34, %v268_v35 }
  0xd4   :  { %v270_v37 = vmul.f32 0.5, %v269_v36 }
  0xd6   :  { %v271_v38 = vsub.f32 1.5, %v270_v37 }
  0xd8   :  { %v272_v40 = vmul.f32 %v613_v34, %v271_v38 }
  0xda   :  { %v276_v41 = vsel %vm275_vm3, %v613_v34, %v272_v40 }
  0xdb   :  { %v277_v42 = vmul.f32 %v276_v41, %v265_v39 }
  0xdd   :  { %v279_v44 = vmul.f32 %v277_v42, %v254_v28  ;;  %v282_v45 = vperm.slane %v277_v42, 0 }
  0xdf   :  { %v280_v46 = vsub.f32 %v278_v43, %v279_v44  ;;  %v284_v47 = vmul.f32 %v282_v45, %v238_v61 }
  0xe1   :  { %v286_v48 = vperm.slane %v280_v46, 0 }
  0xe3   :  { %v288_v49 = vadd.f32 %v286_v48, %v284_v47 }
  0xe5   :  { %v289_v50 = vmax.f32 %v288_v49, 0.0 }
  0xe7   :  { %v290_v51 = vpack.c.bf16 %v289_v50, %v289_v50 }
  0xe9   :  { %401 = vmatmul.bf16.vlgmr.msra.gmra.mxu2 %v290_v51  ;;  %414 = vmatmul.bf16.vlgmr.msra.gmra.mxu3 %v290_v51 }
 0x16c   :  { %v402_v55 = vpop.f32.mrf.mxu2  ;;  %v415_v56 = vpop.f32.mrf.mxu3 }
 0x16d   :  { %v403_v57 = vadd.f32 %v402_v55, %v309_v53  ;;  %v416_v58 = vadd.f32 %v415_v56, %v310_v54 }
 0x16f   :  { %419 = vst [vmem:[#allocation10] sm:$0xff] %v403_v57 }
 0x170   :  { %420 = vst [vmem:[#allocation10 + $0x8] sm:$0xff] %v416_v58 }
 0x171   :  { %431 = dma.vmem_to_hbm [thread:$0]  %s427_s21, 256, %s429_s24, [#allocation4]  }
 0x174   :  { %v404_v59 = vpop.f32.mrf.mxu2  ;;  %v417_v60 = vpop.f32.mrf.mxu3 }
 0x175   :  { %740 = dma.done.wait [#allocation4], 256  }
 0x176   :  { %741 = vsyncadd [#allocation4], 4294967040 }
 0x177   :  { %436 = vsyncpa [#allocation3], 1 }
 0x178   :  { %437 = vsyncpa [#allocation6], 1 }
 0x179   :  { %438 = vsyncpa [#allocation9], 1 }
 0x17a   :  { %439 = vsyncpa [#allocation4], 1 }

</bundles_post_ra>
